<compile_context>
chip_gen: v7x
topology: tpu7x:2x2x1
jax: 0.10.0
libtpu: 0.0.40
codegen_flags: <defaults>
</compile_context>

<pallas_src>
import functools

import jax
import jax.numpy as jnp
from jax.experimental import pallas as pl
from jax.experimental.pallas import tpu as pltpu

_LANES = 128
_MAX_TILE_ROWS = 2048  # 2048 x 128 f32 block = 1 MiB -> 2 in x 2 buf = 4 MiB VMEM


def _cdiv(a, b):
    return -(-a // b)


def _rmse_partial_kernel(yhat_ref, y_ref, out_ref, acc_ref, *,
                         tile_rows, steps_per_core, valid_rows):
    c = pl.program_id(0)  # core-split axis ("parallel")
    i = pl.program_id(1)  # sequential reduction axis ("arbitrary")

    @pl.when(i == 0)
    def _():
        acc_ref[...] = jnp.zeros_like(acc_ref)

    # Elementwise squared difference, accumulated into a VMEM vector
    # accumulator.  Cast to f32 in-kernel (free if inputs are already f32;
    # halves HBM traffic for bf16 callers vs. a wrapper-side upcast).
    d = yhat_ref[...].astype(jnp.float32) - y_ref[...].astype(jnp.float32)

    # Mask rows beyond the real array (ragged final block / out-of-range
    # blocks of the core split).  The mask uses the *intended* global row, so
    # whatever data was actually DMA'd for clamped blocks contributes zero.
    block_idx = c * steps_per_core + i
    row = block_idx * tile_rows + jax.lax.broadcasted_iota(
        jnp.int32, (tile_rows, _LANES), 0)
    sq = jnp.where(row < valid_rows, d * d, jnp.float32(0.0))
    acc_ref[...] += sq

    @pl.when(i == pl.num_programs(1) - 1)
    def _():
        psum = jnp.sum(acc_ref[...])  # single XLU reduce per slice
        out_ref[...] = jnp.full((1, _LANES), psum, dtype=jnp.float32)


def rmse_loss(yhat, y, eps=1e-6):
    assert yhat.shape == y.shape, "yhat and y must have the same shape"
    total_n = int(yhat.size)
    assert total_n > 0

    # Copy-free flatten (metadata-only reshape for contiguous arrays).
    yf = jnp.ravel(yhat)
    xf = jnp.ravel(y)

    # Zero-pad only when numel is not a multiple of 128 so we can form the
    # lane-dense 2D view; zero padding in both operands contributes 0 to the
    # sum of squared differences.  For the common multiple-of-128 case there
    # is no host-side copy at all.
    rem = total_n % _LANES
    if rem:
        pad = _LANES - rem
        yf = jnp.pad(yf, (0, pad))
        xf = jnp.pad(xf, (0, pad))
    rows = _cdiv(total_n, _LANES)
    yf = yf.reshape(rows, _LANES)
    xf = xf.reshape(rows, _LANES)

    # Tile sizing: single full-extent block for small inputs (always a legal
    # block shape), otherwise large aligned row tiles.
    if rows <= _MAX_TILE_ROWS:
        tile_rows = rows
    else:
        tile_rows = _MAX_TILE_ROWS
    steps = _cdiv(rows, tile_rows)

    # Split the reduction into 2 slices; on v7x the "parallel" axis is sharded
    # across the 2 TensorCores, on v5e/v6e it simply runs sequentially.
    n_split = 2 if steps > 1 else 1
    steps_per_core = _cdiv(steps, n_split)

    def _in_index(c, i):
        b = c * steps_per_core + i
        # Clamp so a DMA never starts past the array; fully out-of-range
        # blocks are entirely masked out in the kernel anyway.
        return (jnp.minimum(b, steps - 1), 0)

    kernel = functools.partial(
        _rmse_partial_kernel,
        tile_rows=tile_rows,
        steps_per_core=steps_per_core,
        valid_rows=rows,
    )

    partials = pl.pallas_call(
        kernel,
        out_shape=jax.ShapeDtypeStruct((1, n_split * _LANES), jnp.float32),
        grid_spec=pltpu.PrefetchScalarGridSpec(
            num_scalar_prefetch=0,
            grid=(n_split, steps_per_core),
            in_specs=[
                pl.BlockSpec((tile_rows, _LANES), _in_index),
                pl.BlockSpec((tile_rows, _LANES), _in_index),
            ],
            out_specs=pl.BlockSpec((1, _LANES), lambda c, i: (0, c)),
            scratch_shapes=[pltpu.VMEM((tile_rows, _LANES), jnp.float32)],
        ),
        compiler_params=pltpu.CompilerParams(
            dimension_semantics=("parallel", "arbitrary"),
        ),
    )(yf, xf)

    # Finalize outside the kernel: combine per-slice partial sums.
    per_slice = partials.reshape(n_split, _LANES)[:, 0]
    total = jnp.sum(per_slice)
    return jnp.sqrt(total / jnp.float32(total_n) + jnp.float32(eps))


if __name__ == "__main__":
    key = jax.random.PRNGKey(0)
    k1, k2 = jax.random.split(key)
    # Small NCHW-like shapes consistent with a regression target.
    yhat = jax.random.normal(k1, (2, 4, 16, 16), dtype=jnp.float32)
    y = jax.random.normal(k2, (2, 4, 16, 16), dtype=jnp.float32)

    loss = rmse_loss(yhat, y)
    jax.block_until_ready(loss)

    # Sanity check against plain JAX reference.
    ref = jnp.sqrt(jnp.mean((yhat - y) ** 2) + 1e-6)
    assert jnp.allclose(loss, ref, atol=1e-5, rtol=1e-5), (loss, ref)

    print("KERNEL_OK")
</pallas_src>

<mosaic_0001>
module attributes {stable_mosaic.version = 11 : i64} {
  func.func @_rmse_partial_kernel(%arg0: i32, %arg1: i32, %arg2: memref<16x128xf32, #tpu.memory_space<vmem>>, %arg3: memref<16x128xf32, #tpu.memory_space<vmem>>, %arg4: memref<1x128xf32, #tpu.memory_space<vmem>>, %arg5: memref<16x128xf32, #tpu.memory_space<vmem>>) attributes {dimension_semantics = [#tpu.dimension_semantics<parallel>, #tpu.dimension_semantics<arbitrary>], iteration_bounds = array<i64: 1, 1>, scalar_prefetch = 0 : i64, scratch_operands = 1 : i64, tpu.core_type = #tpu.core_type<tc>, window_params = [{transform_indices = @transform_0, window_bounds = array<i64: 16, 128>}, {transform_indices = @transform_1, window_bounds = array<i64: 16, 128>}, {transform_indices = @transform_2, window_bounds = array<i64: 1, 128>}]} {
    %c0_i32 = arith.constant 0 : i32
    %0 = arith.cmpi eq, %arg1, %c0_i32 : i32
    %1 = arith.extui %0 : i1 to i32
    %c0_i32_0 = arith.constant 0 : i32
    %2 = arith.cmpi ne, %1, %c0_i32_0 : i32
    scf.if %2 {
      %cst_11 = arith.constant 0.000000e+00 : f32
      %23 = vector.broadcast %cst_11 : f32 to vector<16x128xf32>
      %c0_12 = arith.constant 0 : index
      %c0_13 = arith.constant 0 : index
      %24 = vector.load %arg5[%c0_12, %c0_13] : memref<16x128xf32, #tpu.memory_space<vmem>>, vector<16x128xf32>
      tpu.vector_store %arg5[%c0_12, %c0_13], %23 {strides = array<i32>} : memref<16x128xf32, #tpu.memory_space<vmem>>, vector<16x128xf32>,
    } else {
    }
    %c0 = arith.constant 0 : index
    %c0_1 = arith.constant 0 : index
    %3 = vector.load %arg2[%c0, %c0_1] : memref<16x128xf32, #tpu.memory_space<vmem>>, vector<16x128xf32>
    %c0_2 = arith.constant 0 : index
    %c0_3 = arith.constant 0 : index
    %4 = vector.load %arg3[%c0_2, %c0_3] : memref<16x128xf32, #tpu.memory_space<vmem>>, vector<16x128xf32>
    %5 = arith.subf %3, %4 : vector<16x128xf32>
    %c1_i32 = arith.constant 1 : i32
    %6 = arith.muli %arg0, %c1_i32 : i32
    %7 = arith.addi %6, %arg1 : i32
    %c16_i32 = arith.constant 16 : i32
    %8 = arith.muli %7, %c16_i32 : i32
    %9 = tpu.iota {dimensions = array<i32: 0>} : vector<16x128xi32>
    %10 = vector.broadcast %8 : i32 to vector<16x128xi32>
    %11 = arith.addi %10, %9 : vector<16x128xi32>
    %c16_i32_4 = arith.constant 16 : i32
    %12 = vector.broadcast %c16_i32_4 : i32 to vector<16x128xi32>
    %13 = arith.cmpi slt, %11, %12 : vector<16x128xi32>
    %14 = arith.mulf %5, %5 : vector<16x128xf32>
    %cst = arith.constant 0.000000e+00 : f32
    %15 = vector.broadcast %cst : f32 to vector<16x128xf32>
    %16 = arith.select %13, %14, %15 : vector<16x128xi1>, vector<16x128xf32>
    %c0_5 = arith.constant 0 : index
    %c0_6 = arith.constant 0 : index
    %17 = vector.load %arg5[%c0_5, %c0_6] : memref<16x128xf32, #tpu.memory_space<vmem>>, vector<16x128xf32>
    %18 = arith.addf %17, %16 : vector<16x128xf32>
    %c0_7 = arith.constant 0 : index
    %c0_8 = arith.constant 0 : index
    %19 = vector.load %arg5[%c0_7, %c0_8] : memref<16x128xf32, #tpu.memory_space<vmem>>, vector<16x128xf32>
    tpu.vector_store %arg5[%c0_7, %c0_8], %18 {strides = array<i32>} : memref<16x128xf32, #tpu.memory_space<vmem>>, vector<16x128xf32>,
    %c0_i32_9 = arith.constant 0 : i32
    %20 = arith.cmpi eq, %arg1, %c0_i32_9 : i32
    %21 = arith.extui %20 : i1 to i32
    %c0_i32_10 = arith.constant 0 : i32
    %22 = arith.cmpi ne, %21, %c0_i32_10 : i32
    scf.if %22 {
      %c0_11 = arith.constant 0 : index
      %c0_12 = arith.constant 0 : index
      %23 = vector.load %arg5[%c0_11, %c0_12] : memref<16x128xf32, #tpu.memory_space<vmem>>, vector<16x128xf32>
      %24 = vector.shape_cast %23 : vector<16x128xf32> to vector<1x16x128xf32>
      %cst_13 = arith.constant dense<0.000000e+00> : vector<1xf32>
      %25 = vector.multi_reduction <add>, %24, %cst_13 [1, 2] : vector<1x16x128xf32> to vector<1xf32>
      %26 = vector.shape_cast %25 : vector<1xf32> to vector<1x1x1xf32>
      %27 = vector.extract %26[0, 0, 0] : f32 from vector<1x1x1xf32>
      %28 = vector.broadcast %27 : f32 to vector<1x128xf32>
      %c0_14 = arith.constant 0 : index
      %c0_15 = arith.constant 0 : index
      %29 = vector.load %arg4[%c0_14, %c0_15] : memref<1x128xf32, #tpu.memory_space<vmem>>, vector<1x128xf32>
      tpu.vector_store %arg4[%c0_14, %c0_15], %28 {strides = array<i32>} : memref<1x128xf32, #tpu.memory_space<vmem>>, vector<1x128xf32>,
    } else {
    }
    return
  }
  func.func @transform_0(%arg0: i32, %arg1: i32) -> (i32, i32) {
    %c1_i32 = arith.constant 1 : i32
    %0 = arith.muli %arg0, %c1_i32 : i32
    %1 = arith.addi %0, %arg1 : i32
    %c0_i32 = arith.constant 0 : i32
    %2 = arith.minsi %1, %c0_i32 : i32
    %c0_i32_0 = arith.constant 0 : i32
    %c0_i32_1 = arith.constant 0 : i32
    return %2, %c0_i32_0 : i32, i32
  }
  func.func @transform_1(%arg0: i32, %arg1: i32) -> (i32, i32) {
    %c1_i32 = arith.constant 1 : i32
    %0 = arith.muli %arg0, %c1_i32 : i32
    %1 = arith.addi %0, %arg1 : i32
    %c0_i32 = arith.constant 0 : i32
    %2 = arith.minsi %1, %c0_i32 : i32
    %c0_i32_0 = arith.constant 0 : i32
    %c0_i32_1 = arith.constant 0 : i32
    return %2, %c0_i32_0 : i32, i32
  }
  func.func @transform_2(%arg0: i32, %arg1: i32) -> (i32, i32) {
    %c0_i32 = arith.constant 0 : i32
    %c0_i32_0 = arith.constant 0 : i32
    return %c0_i32, %arg0 : i32, i32
  }
}

</mosaic_0001>

<bundles_post_ra>
// kernel: tpu_custom_call.1
= control target key start
LH: loop header
LB: loop body
LE: loop exit
PB: predicated region body
PF: predicated region fallthrough
CT: control target
= control target key end

     0   :  { %7 = vsyncpa [#allocation4], 0  ;;  %s264_s0 = inlined_call_operand.hbm [shape: f32[16,128], index: 0, kind: input, shape index: {}]   ;;  %s265_s1 = inlined_call_operand.hbm [shape: f32[16,128], index: 1, kind: input, shape index: {}]   ;;  %s266_s2 = inlined_call_operand.hbm [shape: f32[1,128], index: 2, kind: output, shape index: {}]  }
   0x1   :  { %8 = vsyncpa [#allocation7], 0 }
   0x2   :  { %9 = vsyncpa [#allocation5], 0  ;;  %s208_s9 = smov [#allocation3]   ;;  %s136_s13 = scalar_lea.hbm %s264_s0, 256 }
   0x3   :  { %s21_s10 = sshll.u32 %s208_s9, 4  ;;  %p137_p0 = scmp.ne.s32.totalorder %s264_s0, %s136_s13  ;;  %s22_s10 = int_to_ptr.vmem [resolvable:$true] %s21_s10 }
   0x4   :  { %p140_p1 = scmp.lt.u32.totalorder %s136_s13, %s264_s0 }
   0x6   :  { %p142_p2 = pnand %p140_p1, %p137_p0 }
   0x8   :  { %145 = shalt.err (!%p142_p2)
}
   0x9   :  { %s146_s18 = scalar_lea.vmem %s22_s10, 256  ;;  %p151_p4 = scmp.lt.s32.totalorder %s22_s10, %s22_s10 }
   0xa   :  { %p147_p3 = scmp.ne.s32.totalorder %s22_s10, %s146_s18  ;;  %p152_p5 = scmp.lt.s32.totalorder %s146_s18, %s146_s18 }
   0xc   :  { %p153_p6 = por %p152_p5, %p151_p4 }
   0xe   :  { %p154_p7 = pnand %p153_p6, %p147_p3 }
  0x10   :  { %157 = shalt.err (!%p154_p7)
}
  0x11   :  { %s209_s19 = smov 128   ;;  %s210_s20 = smov 8  }
  0x12   :  { %27 = dma.hbm_to_vmem [thread:$0]  %s264_s0, 256, %s22_s10, [#allocation4], %s209_s19, %s209_s19, %s210_s20  }
  0x13   :  { %s211_s23 = smov [#allocation6]   ;;  %s158_s27 = scalar_lea.hbm %s265_s1, 256 }
  0x14   :  { %s39_s24 = sshll.u32 %s211_s23, 4  ;;  %p159_p8 = scmp.ne.s32.totalorder %s265_s1, %s158_s27  ;;  %s40_s24 = int_to_ptr.vmem [resolvable:$true] %s39_s24 }
  0x15   :  { %p162_p9 = scmp.lt.u32.totalorder %s158_s27, %s265_s1 }
  0x17   :  { %p164_p10 = pnand %p162_p9, %p159_p8 }
  0x19   :  { %167 = shalt.err (!%p164_p10)
}
  0x1a   :  { %s168_s4 = scalar_lea.vmem %s40_s24, 256  ;;  %p173_p12 = scmp.lt.s32.totalorder %s40_s24, %s40_s24 }
  0x1b   :  { %p169_p11 = scmp.ne.s32.totalorder %s40_s24, %s168_s4  ;;  %p174_p13 = scmp.lt.s32.totalorder %s168_s4, %s168_s4 }
  0x1d   :  { %p175_p0 = por %p174_p13, %p173_p12 }
  0x1f   :  { %p176_p1 = pnand %p175_p0, %p169_p11 }
  0x21   :  { %179 = shalt.err (!%p176_p1)
}
  0x22   :  { %45 = dma.hbm_to_vmem [thread:$0]  %s265_s1, 256, %s40_s24, [#allocation7], %s209_s19, %s209_s19, %s210_s20  }
  0x23   :  { %202 = dma.done.wait [#allocation4], 256  }
  0x24   :  { %203 = vsyncadd [#allocation4], 4294967040 }
  0x25   :  { %204 = dma.done.wait [#allocation7], 256  }
  0x26   :  { %205 = vsyncadd [#allocation7], 4294967040  ;;  %v66_v0 = vld [vmem:[#allocation3] sm:$0xff]  ;;  %v67_v1 = vld [vmem:[#allocation3 + $0x8] sm:$0xff]  ;;  %s212_s1 = smov [#allocation8]  }
  0x27   :  { %v68_v2 = vld [vmem:[#allocation6] sm:$0xff]  ;;  %v69_v3 = vld [vmem:[#allocation6 + $0x8] sm:$0xff]  ;;  %s115_s6 = sshll.u32 %s212_s1, 4  ;;  %s116_s6 = int_to_ptr.vmem [resolvable:$true] %s115_s6 }
  0x28   :  { %v70_v4 = vsub.f32 %v66_v0, %v68_v2  ;;  %v71_v5 = vsub.f32 %v67_v1, %v69_v3  ;;  %s180_s8 = scalar_lea.vmem %s116_s6, 16  ;;  %s184_s9 = scalar_lea.vmem %s116_s6, 32 }
  0x29   :  { %p181_p2 = scmp.ne.s32.totalorder %s116_s6, %s180_s8  ;;  %p185_p3 = scmp.lt.s32.totalorder %s116_s6, %s116_s6 }
  0x2a   :  { %v82_v6 = vmul.f32 %v70_v4, %v70_v4  ;;  %v83_v7 = vmul.f32 %v71_v5, %v71_v5  ;;  %p186_p4 = scmp.lt.s32.totalorder %s184_s9, %s180_s8 }
  0x2c   :  { %v97_v8 = vadd.f32 %v83_v7, %v82_v6  ;;  %p187_p5 = por %p186_p4, %p185_p3 }
  0x2e   :  { %98 = vadd.xlane.f32.xlu0 %v97_v8  ;;  %p188_p6 = pnand %p187_p5, %p181_p2 }
  0xbb   :  { %v99_v9 = vpop.xlane.xlu0 %98 }
  0xbc   :  { %v100_v10 = vrot.slane %v99_v9, 4 }
  0xbe   :  { %v101_v11 = vadd.f32 %v100_v10, %v99_v9 }
  0xc0   :  { %v102_v12 = vrot.slane %v101_v11, 2 }
  0xc2   :  { %v103_v13 = vadd.f32 %v102_v12, %v101_v11 }
  0xc4   :  { %v104_v14 = vrot.slane %v103_v13, 1 }
  0xc6   :  { %v105_v15 = vadd.f32 %v104_v14, %v103_v13 }
  0xc8   :  { %129 = vpush %v105_v15 }
  0xf9   :  { %s130_s7 = spop %129 }
  0xfa   :  { %v107_v16 = vstv %s130_s7 }
  0xfb   :  { %108 = vst [vmem:[#allocation8] sm:$0x1] %v107_v16 }
  0xfc   :  { %191 = shalt.err (!%p188_p6)
}
  0xfd   :  { %s192_s12 = scalar_lea.hbm %s266_s2, 16 }
  0xfe   :  { %p193_p7 = scmp.ne.s32.totalorder %s266_s2, %s192_s12  ;;  %p196_p8 = scmp.lt.u32.totalorder %s192_s12, %s266_s2 }
 0x100   :  { %p198_p9 = pnand %p196_p8, %p193_p7 }
 0x102   :  { %201 = shalt.err (!%p198_p9)
}
 0x103   :  { %118 = dma.vmem_to_hbm [thread:$0]  %s116_s6, 16, %s266_s2, [#allocation5]  }
 0x104   :  { %206 = dma.done.wait [#allocation5], 16  }
 0x105   :  { %207 = vsyncadd [#allocation5], 4294967280 }
 0x106   :  { %122 = vsyncpa [#allocation4], 1 }
 0x107   :  { %123 = vsyncpa [#allocation7], 1 }
 0x108   :  { %124 = vsyncpa [#allocation5], 1 }

</bundles_post_ra>
